<compile_context>
chip_gen: v6e
topology: v6e:2x2x1
jax: 0.10.0
libtpu: 0.0.40
codegen_flags: <defaults>
</compile_context>

<pallas_src>
import jax
import jax.numpy as jnp
from jax.experimental import pallas as pl
from jax.experimental.pallas import tpu as pltpu


def _mtl_kernel(losses_ref, log_var_ref, out_ref):
    # losses_ref, log_var_ref: (1, N) f32 whole-array VMEM blocks (grid-less).
    # out_ref: (1, 1) f32 in SMEM (scalar-path store, no padded VMEM writeback).
    ls = losses_ref[...]                      # whole-block load
    lv = log_var_ref[...]                     # whole-block load
    term = jnp.exp(-lv) * ls + lv             # exp on EUP, mul/add on VPU
    out_ref[0, 0] = jnp.sum(term)             # XLU reduce -> scalar SMEM store


def _mtl_total_impl(losses: jax.Array, log_var: jax.Array) -> jax.Array:
    num_tasks = losses.shape[0]
    # Metadata-only reshapes; two separate operands, no wrapper-side stack.
    ls2 = losses.astype(jnp.float32)[None, :]     # (1, N)
    lv2 = log_var.astype(jnp.float32)[None, :]    # (1, N)

    out = pl.pallas_call(
        _mtl_kernel,
        out_shape=jax.ShapeDtypeStruct((1, 1), jnp.float32),
        in_specs=[pl.BlockSpec(memory_space=pltpu.VMEM),
                  pl.BlockSpec(memory_space=pltpu.VMEM)],
        out_specs=pl.BlockSpec(memory_space=pltpu.SMEM),
        cost_estimate=pl.CostEstimate(
            flops=3 * num_tasks,            # mul + add + sum
            transcendentals=num_tasks,      # exp
            bytes_accessed=2 * num_tasks * 4 + 4,
        ),
    )(ls2, lv2)
    return out[0, 0]


# --- custom VJP so log_var (and the per-task losses) are trainable ----------
@jax.custom_vjp
def _mtl_total(losses: jax.Array, log_var: jax.Array) -> jax.Array:
    return _mtl_total_impl(losses, log_var)


def _mtl_fwd(losses, log_var):
    return _mtl_total_impl(losses, log_var), (losses, log_var)


def _mtl_bwd(res, g):
    losses, log_var = res
    inv_var = jnp.exp(-log_var)
    d_losses = (g * inv_var).astype(losses.dtype)
    d_log_var = (g * (1.0 - losses * inv_var)).astype(log_var.dtype)
    return d_losses, d_log_var


_mtl_total.defvjp(_mtl_fwd, _mtl_bwd)


@jax.jit
def multitask_loss(losses: jax.Array, log_var: jax.Array):
    """losses: (num_tasks,) stacked scalar losses; log_var: (num_tasks,) parameter.

    Returns (total_loss_scalar, log_var_array). The PyTorch module returns
    log_var.data.tolist(); that host sync is intentionally left to the caller
    (outside jit) so the hot path never forces a device->host transfer.
    """
    assert losses.shape == log_var.shape and losses.ndim == 1
    return _mtl_total(losses, log_var), log_var


if __name__ == "__main__":
    num_tasks = 4

    # Deterministic parameter init, matching nn.Parameter(torch.zeros((num_tasks,)))
    log_var = jnp.zeros((num_tasks,), jnp.float32)

    # Deterministic example per-task scalar losses (stand-ins for the *losses args)
    key = jax.random.PRNGKey(0)
    losses = jax.random.uniform(key, (num_tasks,), jnp.float32, minval=0.1, maxval=2.0)

    total, log_var_out = multitask_loss(losses, log_var)
    total = jax.block_until_ready(total)

    # Pure-JAX reference check (forward)
    ref = jnp.sum(jnp.exp(-log_var) * losses + log_var)
    assert jnp.allclose(total, ref, rtol=1e-6, atol=1e-6), (total, ref)

    # Gradient check (custom_vjp; backward is plain jnp)
    g_ls, g_lv = jax.grad(_mtl_total, argnums=(0, 1))(losses, log_var)
    assert jnp.allclose(g_ls, jnp.exp(-log_var), rtol=1e-6, atol=1e-6)
    assert jnp.allclose(g_lv, 1.0 - losses * jnp.exp(-log_var), rtol=1e-6, atol=1e-6)

    # torch ".tolist()" equivalent, done lazily OUTSIDE the jitted hot path.
    log_var_list = [float(v) for v in jax.device_get(log_var_out)]
    assert log_var_list == [0.0] * num_tasks

    print("KERNEL_OK")
</pallas_src>

<mosaic_0001>
module attributes {stable_mosaic.version = 11 : i64} {
  func.func @_mtl_kernel(%arg0: memref<1x4xf32, #tpu.memory_space<vmem>>, %arg1: memref<1x4xf32, #tpu.memory_space<vmem>>, %arg2: memref<1x1xf32, #tpu.memory_space<smem>>) attributes {dimension_semantics = [], scalar_prefetch = 0 : i64, scratch_operands = 0 : i64, tpu.core_type = #tpu.core_type<tc>} {
    %c0 = arith.constant 0 : index
    %c0_0 = arith.constant 0 : index
    %0 = vector.load %arg0[%c0, %c0_0] : memref<1x4xf32, #tpu.memory_space<vmem>>, vector<1x4xf32>
    %c0_1 = arith.constant 0 : index
    %c0_2 = arith.constant 0 : index
    %1 = vector.load %arg1[%c0_1, %c0_2] : memref<1x4xf32, #tpu.memory_space<vmem>>, vector<1x4xf32>
    %cst = arith.constant 0.000000e+00 : f32
    %2 = vector.broadcast %cst : f32 to vector<1x4xf32>
    %3 = arith.subf %2, %1 : vector<1x4xf32>
    %4 = math.exp %3 : vector<1x4xf32>
    %5 = arith.mulf %4, %0 : vector<1x4xf32>
    %6 = arith.addf %5, %1 : vector<1x4xf32>
    %7 = vector.shape_cast %6 : vector<1x4xf32> to vector<1x1x4xf32>
    %cst_3 = arith.constant dense<0.000000e+00> : vector<1xf32>
    %8 = vector.multi_reduction <add>, %7, %cst_3 [1, 2] : vector<1x1x4xf32> to vector<1xf32>
    %9 = vector.shape_cast %8 : vector<1xf32> to vector<1x1x1xf32>
    %10 = vector.extract %9[0, 0, 0] : f32 from vector<1x1x1xf32>
    %c0_4 = arith.constant 0 : index
    %c0_5 = arith.constant 0 : index
    %11 = memref.load %arg2[%c0_4, %c0_5] : memref<1x1xf32, #tpu.memory_space<smem>>
    memref.store %10, %arg2[%c0_4, %c0_5] : memref<1x1xf32, #tpu.memory_space<smem>>
    return
  }
}

</mosaic_0001>

<bundles_post_ra>
// kernel: multitask_loss.1
= control target key start
LH: loop header
LB: loop body
LE: loop exit
PB: predicated region body
PF: predicated region fallthrough
CT: control target
= control target key end

     0   :  { %s85_s0 = inlined_call_operand.vmem [shape: f32[1,4], index: 0, kind: input, shape index: {}]   ;;  %s86_s1 = inlined_call_operand.vmem [shape: f32[1,4], index: 1, kind: input, shape index: {}]   ;;  %s87_s2 = inlined_call_operand.hbm [shape: f32[1,1], index: 2, kind: output, shape index: {}]  }
   0x1   :  { %v13_v0 = vld [vmem:[%s86_s1] sm:$0x1] }
   0x2   :  { %v14_v1 = vsub.f32 0.0, %v13_v0 }
   0x3   :  { %7 = vsyncpa [#allocation3], 0  ;;  %v12_v3 = vld [vmem:[%s85_s0] sm:$0x1]  ;;  %vm19_vm0 = vcmask 24576   ;;  %s60_s13 = smov [#allocation2]  }
   0x4   :  { %v15_v2 = vmul.f32 1.442695, %v14_v1 }
   0x6   :  { %48 = vpow2.f32 %v15_v2 }
  0x13   :  { %v49_v4 = vpop.eup %48 }
  0x14   :  { %v17_v5 = vmul.f32 %v49_v4, %v12_v3 }
  0x16   :  { %v18_v6 = vadd.f32 %v17_v5, %v13_v0 }
  0x18   :  { %v20_v7 = vsel %vm19_vm0, %v18_v6, 0.0 }
  0x19   :  { %21 = vadd.xlane.f32.xlu0 %v20_v7 }
  0xa2   :  { %v22_v8 = vpop.xlane.xlu0 %21 }
  0xa3   :  { %v23_v9 = vrot.slane %v22_v8, 4 }
  0xa5   :  { %v24_v10 = vadd.f32 %v23_v9, %v22_v8 }
  0xa7   :  { %v25_v11 = vrot.slane %v24_v10, 2 }
  0xa9   :  { %v26_v12 = vadd.f32 %v25_v11, %v24_v10 }
  0xab   :  { %v27_v13 = vrot.slane %v26_v12, 1 }
  0xad   :  { %v28_v14 = vadd.f32 %v27_v13, %v26_v12 }
  0xaf   :  { %45 = vpush %v28_v14 }
  0xe0   :  { %s46_s1 = spop %45 }
  0xe1   :  { %31 = sst [smem:[#allocation2]] %s46_s1 }
  0xe2   :  { %39 = dma.smem_to_hbm %s60_s13, 16, %s87_s2, [#allocation3]  }
  0xe3   :  { %58 = dma.done.wait [#allocation3], 16  }
  0xe4   :  { %59 = vsyncadd [#allocation3], 4294967280 }
  0xe5   :  { %43 = sfence }
  0xe6   :  { %44 = vsyncpa [#allocation3], 1 }

</bundles_post_ra>
